<compile_context>
chip_gen: v5e
topology: v5e:2x2
jax: 0.10.0
libtpu: 0.0.40
codegen_flags: <defaults>
</compile_context>

<pallas_src>
import functools

import jax
import jax.numpy as jnp
from jax import lax
from jax.experimental import pallas as pl
from jax.experimental.pallas import tpu as pltpu


# ---------------------------------------------------------------------------
# helpers
# ---------------------------------------------------------------------------
def _lane_tile(total, cap):
    """Largest multiple of 128 that divides `total` and is <= cap, else `total`
    (a full-extent block is always legal)."""
    if total % 128 != 0:
        return total
    cap = max(128, cap - cap % 128)
    t = min(total, cap)
    t -= t % 128
    while total % t != 0:
        t -= 128
    return t


# -------------------- Pallas kernel 1: pixel normalization -----------------
def _normalize_kernel(scale_ref, shift_ref, x_ref, o_ref):
    # out = x * (1/std) + (-mean/std)   -> single VPU mul+add, no divide.
    o_ref[...] = x_ref[...] * scale_ref[...] + shift_ref[...]


@jax.jit
def normalize_images(images, pixel_mean, pixel_std):
    """(x - mean) / std per channel.  images: (N, C, H, W) float32."""
    N, C, H, W = images.shape
    R, L = N * C, H * W

    inv_std = 1.0 / pixel_std                           # exact host reciprocal
    scale = jnp.tile(inv_std, N).reshape(R, 1)          # per-(n,c)-row scale
    shift = jnp.tile(-pixel_mean * inv_std, N).reshape(R, 1)

    x2 = images.reshape(R, L)                           # contiguous -> free
    # lane-dense column tile, ~<=4 MiB per input block
    bc = _lane_tile(L, max(128, (4 << 20) // max(R * 4, 1)))

    out = pl.pallas_call(
        _normalize_kernel,
        out_shape=jax.ShapeDtypeStruct((R, L), images.dtype),
        grid=(L // bc,),
        in_specs=[
            pl.BlockSpec((R, 1), lambda j: (0, 0)),
            pl.BlockSpec((R, 1), lambda j: (0, 0)),
            pl.BlockSpec((R, bc), lambda j: (0, j)),
        ],
        out_specs=pl.BlockSpec((R, bc), lambda j: (0, j)),
        compiler_params=pltpu.CompilerParams(
            dimension_semantics=("parallel",)),
    )(scale, shift, x2)
    return out.reshape(N, C, H, W)


# -------------------- Pallas kernel 2: top_layer 3x3 conv ------------------
def _conv3x3_kernel(x_ref, w_ref, b_ref, out_ref, acc_ref, *, row_stride, n_q):
    """3x3 conv as 9 shifted matmuls with a VMEM f32 accumulator.

    x_ref  : (Cin, Lp)   zero-padded image, flattened spatial (row stride W+2)
    w_ref  : (9, Cout, Cin)   one (Cout, Cin) tap per kernel position
    b_ref  : (Cout, 1)
    out_ref: (Cout, TQ)  lane-dense flattened-spatial tile (NCHW order)
    acc_ref: (Cout, TQ)  f32 scratch
    """
    tq = out_ref.shape[-1]
    halo = 2 * row_stride + 2

    if n_q == 1:
        q0 = 0                                             # fully static path
    else:
        q0 = pl.multiple_of(pl.program_id(1) * tq, 128)    # TQ % 128 == 0

    # One (aligned) slab covering this tile plus the 3x3 halo; the 9 tap
    # windows below are static lane shifts of it.
    slab = x_ref[:, pl.ds(q0, tq + halo)]                  # (Cin, tq + halo)

    acc_ref[...] = jnp.zeros_like(acc_ref)
    for k in range(9):
        ky, kx = divmod(k, 3)
        off = ky * row_stride + kx
        acc_ref[...] += jnp.dot(w_ref[k], slab[:, off:off + tq],
                                preferred_element_type=jnp.float32)
    out_ref[...] = (acc_ref[...] + b_ref[...]).astype(out_ref.dtype)


@jax.jit
def top_layer_conv(x, weight, bias):
    """Conv2d(Cin, Cout, k=3, s=1, p=1), NCHW in / NCHW out.

    x: (N, Cin, H, W), weight: (Cout, Cin, 3, 3), bias: (Cout,)
    """
    N, Cin, H, W = x.shape
    Cout = weight.shape[0]
    W2 = W + 2                        # padded row stride
    Lq_raw = H * W2                   # flat outputs per image (2 pad cols/row)

    # lane-dense spatial tile (always a multiple of 128), capped at 2048
    TQ = min(2048, -(-Lq_raw // 128) * 128)
    n_q = -(-Lq_raw // TQ)
    Lq = n_q * TQ
    halo = 2 * W2 + 2
    Lp = Lq + halo                    # flat padded length needed by the taps

    # Single zero-padded copy, flattened so spatial is the lane dim.
    xp = jnp.pad(x, ((0, 0), (0, 0), (1, 1), (1, 1)))      # (N, Cin, H+2, W2)
    xflat = xp.reshape(N, Cin, (H + 2) * W2)
    xflat = jnp.pad(xflat, ((0, 0), (0, 0), (0, Lp - (H + 2) * W2)))

    # Weight taps: w9[ky*3+kx] == weight[:, :, ky, kx]  -> (9, Cout, Cin)
    # NOTE: cast xflat/w9 to bf16 here (keep f32 accumulate) on v6e/v7x when
    # the matmul is MXU-bound.
    w9 = weight.transpose(2, 3, 0, 1).reshape(9, Cout, Cin)
    b2 = bias.reshape(Cout, 1)

    flops = int(2 * N * Lq * 9 * Cin * Cout)
    bytes_accessed = int(4 * (N * Cin * Lp + 9 * Cout * Cin + Cout + N * Cout * Lq))

    out_flat = pl.pallas_call(
        functools.partial(_conv3x3_kernel, row_stride=W2, n_q=n_q),
        out_shape=jax.ShapeDtypeStruct((N, Cout, Lq), x.dtype),
        grid=(N, n_q),
        in_specs=[
            pl.BlockSpec((None, Cin, Lp), lambda n, t: (n, 0, 0)),
            pl.BlockSpec((9, Cout, Cin), lambda n, t: (0, 0, 0)),
            pl.BlockSpec((Cout, 1), lambda n, t: (0, 0)),
        ],
        out_specs=pl.BlockSpec((None, Cout, TQ), lambda n, t: (n, 0, t)),
        scratch_shapes=[pltpu.VMEM((Cout, TQ), jnp.float32)],
        compiler_params=pltpu.CompilerParams(
            dimension_semantics=("parallel", "parallel"),
            vmem_limit_bytes=32 * 1024 * 1024),
        cost_estimate=pl.CostEstimate(
            flops=flops, transcendentals=0, bytes_accessed=bytes_accessed),
    )(xflat, w9, b2)

    # Strip tile tail + per-row pad columns; the reshape is a contiguous split.
    out = out_flat[:, :, :Lq_raw].reshape(N, Cout, H, W2)[:, :, :, :W]
    return out


# -------------------- BlendMask-style wrapper -------------------------------
class BlendMaskPallas:
    def __init__(self, key, in_channels=32, num_bases=4, attn_size=2):
        attn_len = num_bases * attn_size * attn_size
        kw, _ = jax.random.split(key)
        # torch.nn.init.normal_(weight, std=0.01); bias = 0
        self.top_w = 0.01 * jax.random.normal(
            kw, (attn_len, in_channels, 3, 3), dtype=jnp.float32)
        self.top_b = jnp.zeros((attn_len,), dtype=jnp.float32)
        # COCO-style pixel statistics (deterministic, not loaded from disk)
        self.pixel_mean = jnp.array([103.53, 116.28, 123.675], dtype=jnp.float32)
        self.pixel_std = jnp.array([57.375, 57.12, 58.395], dtype=jnp.float32)

    def forward(self, images, fpn_features):
        normed = normalize_images(images, self.pixel_mean, self.pixel_std)
        # TODO(synk): features = backbone(normed); here fpn_features stand in.
        attn = top_layer_conv(fpn_features, self.top_w, self.top_b)
        # TODO(synk): proposal_generator / basis_module / blender not modeled.
        return normed, attn


if __name__ == "__main__":
    key = jax.random.PRNGKey(0)
    k_img, k_feat, k_param = jax.random.split(key, 3)

    N, H, W = 2, 16, 16
    in_channels, num_bases, attn_size = 32, 4, 2

    images = 255.0 * jax.random.uniform(k_img, (N, 3, H, W), dtype=jnp.float32)
    feats = jax.random.normal(k_feat, (N, in_channels, H, W), dtype=jnp.float32)

    model = BlendMaskPallas(k_param, in_channels, num_bases, attn_size)
    normed, attn = model.forward(images, feats)
    jax.block_until_ready(normed)
    jax.block_until_ready(attn)

    # Reference checks (plain JAX / XLA).
    ref_norm = (images - model.pixel_mean.reshape(1, 3, 1, 1)) \
        / model.pixel_std.reshape(1, 3, 1, 1)
    ref_attn = lax.conv_general_dilated(
        feats, model.top_w, window_strides=(1, 1), padding=((1, 1), (1, 1)),
        dimension_numbers=("NCHW", "OIHW", "NCHW"),
    ) + model.top_b.reshape(1, -1, 1, 1)

    assert normed.shape == (N, 3, H, W)
    assert attn.shape == (N, num_bases * attn_size * attn_size, H, W)
    assert jnp.allclose(normed, ref_norm, atol=1e-5, rtol=1e-5)
    assert jnp.allclose(attn, ref_attn, atol=1e-4, rtol=1e-4)

    print("KERNEL_OK")
</pallas_src>

<mosaic_0001>
module attributes {stable_mosaic.version = 11 : i64} {
  func.func @_normalize_kernel(%arg0: i32, %arg1: memref<6x1xf32, #tpu.memory_space<vmem>>, %arg2: memref<6x1xf32, #tpu.memory_space<vmem>>, %arg3: memref<6x256xf32, #tpu.memory_space<vmem>>, %arg4: memref<6x256xf32, #tpu.memory_space<vmem>>) attributes {dimension_semantics = [#tpu.dimension_semantics<parallel>], iteration_bounds = array<i64: 1>, scalar_prefetch = 0 : i64, scratch_operands = 0 : i64, tpu.core_type = #tpu.core_type<tc>, window_params = [{pipeline_mode = #tpu.pipeline_mode<synchronous>, transform_indices = @transform_0, window_bounds = array<i64: 6, 1>}, {pipeline_mode = #tpu.pipeline_mode<synchronous>, transform_indices = @transform_1, window_bounds = array<i64: 6, 1>}, {transform_indices = @transform_2, window_bounds = array<i64: 6, 256>}, {transform_indices = @transform_3, window_bounds = array<i64: 6, 256>}]} {
    %c0 = arith.constant 0 : index
    %c0_0 = arith.constant 0 : index
    %0 = vector.load %arg3[%c0, %c0_0] : memref<6x256xf32, #tpu.memory_space<vmem>>, vector<6x256xf32>
    %c0_1 = arith.constant 0 : index
    %c0_2 = arith.constant 0 : index
    %1 = vector.load %arg1[%c0_1, %c0_2] : memref<6x1xf32, #tpu.memory_space<vmem>>, vector<6x1xf32>
    %2 = vector.broadcast %1 : vector<6x1xf32> to vector<6x256xf32>
    %3 = arith.mulf %0, %2 : vector<6x256xf32>
    %c0_3 = arith.constant 0 : index
    %c0_4 = arith.constant 0 : index
    %4 = vector.load %arg2[%c0_3, %c0_4] : memref<6x1xf32, #tpu.memory_space<vmem>>, vector<6x1xf32>
    %5 = vector.broadcast %4 : vector<6x1xf32> to vector<6x256xf32>
    %6 = arith.addf %3, %5 : vector<6x256xf32>
    %c0_5 = arith.constant 0 : index
    %c0_6 = arith.constant 0 : index
    %7 = vector.load %arg4[%c0_5, %c0_6] : memref<6x256xf32, #tpu.memory_space<vmem>>, vector<6x256xf32>
    tpu.vector_store %arg4[%c0_5, %c0_6], %6 {strides = array<i32>} : memref<6x256xf32, #tpu.memory_space<vmem>>, vector<6x256xf32>,
    return
  }
  func.func @transform_0(%arg0: i32) -> (i32, i32) {
    %c0_i32 = arith.constant 0 : i32
    %c0_i32_0 = arith.constant 0 : i32
    %c0_i32_1 = arith.constant 0 : i32
    return %c0_i32, %c0_i32_0 : i32, i32
  }
  func.func @transform_1(%arg0: i32) -> (i32, i32) {
    %c0_i32 = arith.constant 0 : i32
    %c0_i32_0 = arith.constant 0 : i32
    %c0_i32_1 = arith.constant 0 : i32
    return %c0_i32, %c0_i32_0 : i32, i32
  }
  func.func @transform_2(%arg0: i32) -> (i32, i32) {
    %c0_i32 = arith.constant 0 : i32
    %c0_i32_0 = arith.constant 0 : i32
    return %c0_i32, %arg0 : i32, i32
  }
  func.func @transform_3(%arg0: i32) -> (i32, i32) {
    %c0_i32 = arith.constant 0 : i32
    %c0_i32_0 = arith.constant 0 : i32
    return %c0_i32, %arg0 : i32, i32
  }
}

</mosaic_0001>

<bundles_post_ra>
// kernel: tile.0
= control target key start
LH: loop header
LB: loop body
LE: loop exit
PB: predicated region body
PF: predicated region fallthrough
CT: control target
= control target key end

     0   :  { %s26_s8 = smov 126   ;;  %vm7_vm0 = vcmask 7168   ;;  %s49_s0 = inlined_call_operand.vmem [shape: f32[2,3], index: 0, kind: input, shape index: {}]   ;;  %s50_s1 = inlined_call_operand.vmem [shape: f32[6,1], index: 1, kind: output, shape index: {}]  }
   0x1   :  { %v4_v0 = vld [vmem:[%s49_s0] sm:$0x3]  ;;  %s25_s0 = smov 127  }
   0x2   :  { %5 = vst [vmem:[#allocation0] sm:$0x3] %v4_v0 }
   0x9   :  { %v9_v1 = vld [vmem:[#allocation0] sm:$0x3]  }
   0xa   :  { %10 = vrot.lane.b32.xlu0 %v9_v1, %s25_s0  ;;  %v15_v2 = vld [vmem:[#allocation0] sm:$0x3]  }
   0xb   :  { %v6_v3 = vld [vmem:[#allocation0] sm:$0x3]  }
   0xc   :  { %8 = vst.msk [vmem:[%s50_s1] ss:$3 sm:$0x3] %vm7_vm0, %v6_v3  }
  0x12   :  { %16 = vrot.lane.b32.xlu0 %v15_v2, %s26_s8 }
  0x7c   :  { %v11_v4 = vpop.permute.xlu0 %10  }
  0x7d   :  { %21 = vst.msk [vmem:[%s50_s1 + $0x1] ss:$3 sm:$0x3] %vm7_vm0, %v11_v4  }
  0x84   :  { %v17_v5 = vpop.permute.xlu0 %16  }
  0x85   :  { %22 = vst.msk [vmem:[%s50_s1 + $0x2] ss:$3 sm:$0x3] %vm7_vm0, %v17_v5  }

// kernel: tile.18
= control target key start
LH: loop header
LB: loop body
LE: loop exit
PB: predicated region body
PF: predicated region fallthrough
CT: control target
= control target key end

     0   :  { %s22_s0 = inlined_call_operand.vmem [shape: f32[3], index: 0, kind: input, shape index: {}]   ;;  %s23_s1 = inlined_call_operand.vmem [shape: f32[2,3], index: 1, kind: output, shape index: {}]  }
   0x1   :  { %v4_v0 = vld [vmem:[%s22_s0] ss:$0 sm:$0xff] }
   0x2   :  { %5 = vst [vmem:[%s23_s1] sm:$0x3] %v4_v0 }

// kernel: normalize_images.1
= control target key start
LH: loop header
LB: loop body
LE: loop exit
PB: predicated region body
PF: predicated region fallthrough
CT: control target
= control target key end

     0   :  { %v40_v0 = vmov 0   ;;  %s79_s0 = inlined_call_operand.vmem [shape: f32[6,1], index: 0, kind: input, shape index: {}]   ;;  %s80_s1 = inlined_call_operand.vmem [shape: f32[6,1], index: 1, kind: input, shape index: {}]   ;;  %s81_s2 = inlined_call_operand.vmem [shape: f32[6,256], index: 2, kind: input, shape index: {}]   ;;  %s82_s3 = inlined_call_operand.vmem [shape: f32[6,256], index: 3, kind: output, shape index: {}]  }
   0x1   :  { %39 = vset.pattern.permute.xlu0 %v40_v0  ;;  %v16_v1 = vld [vmem:[%s79_s0] sm:$0x3f]  ;;  %v15_v5 = vld [vmem:[%s81_s2 + $0x8] sm:$0x3f] }
   0x2   :  { %19 = vperm.xlu0 %39, %v16_v1   ;;  %v24_v2 = vld [vmem:[%s80_s1] sm:$0x3f] }
   0x3   :  { %v14_v4 = vld [vmem:[%s81_s2] sm:$0x3f] }
   0xa   :  { %27 = vperm.xlu0 %39, %v24_v2  }
  0x74   :  { %v20_v3 = vpop.permute.xlu0 %19 }
  0x75   :  { %v22_v6 = vmul.f32 %v20_v3, %v14_v4  ;;  %v23_v7 = vmul.f32 %v20_v3, %v15_v5 }
  0x7c   :  { %v28_v8 = vpop.permute.xlu0 %27 }
  0x7d   :  { %v30_v9 = vadd.f32 %v28_v8, %v22_v6  ;;  %v31_v10 = vadd.f32 %v28_v8, %v23_v7 }
  0x7f   :  { %32 = vst [vmem:[%s82_s3] sm:$0x3f] %v30_v9 }
  0x80   :  { %33 = vst [vmem:[%s82_s3 + $0x8] sm:$0x3f] %v31_v10 }

</bundles_post_ra>
